<compile_context>
chip_gen: v6e
topology: v6e:2x2x1
jax: 0.10.0
libtpu: 0.0.40
codegen_flags: <defaults>
</compile_context>

<pallas_src>
import jax
import jax.numpy as jnp
from jax import lax
from jax.experimental import pallas as pl
from jax.experimental.pallas import tpu as pltpu


# ---------------------------------------------------------------------------
# Pallas kernel:  out[b, o, m] = sum_i x[b, i, m] * w[o, i, m]   (complex,
# split into real/imag f32).  M (flattened modes) is the lane axis.
# ---------------------------------------------------------------------------
def _spectral_contract_kernel(xr_ref, xi_ref, wr_ref, wi_ref, or_ref, oi_ref):
    # xr/xi : (B, Cin, TM)    wr/wi : (TO, Cin, TM)    or/oi : (B, TO, TM)
    xr = xr_ref[...][:, None, :, :]      # (B, 1, Cin, TM)
    xi = xi_ref[...][:, None, :, :]
    wr = wr_ref[...][None, :, :, :]      # (1, TO, Cin, TM)
    wi = wi_ref[...][None, :, :, :]
    # Complex multiply, reduce over in_channels (sublane axis of the 4-D temp).
    or_ref[...] = jnp.sum(xr * wr - xi * wi, axis=2)
    oi_ref[...] = jnp.sum(xr * wi + xi * wr, axis=2)


def _mode_tile(mpad):
    """Largest lane-tile (multiple of 128) that divides the padded mode axis."""
    for tm in (512, 384, 256, 128):
        if tm <= mpad and mpad % tm == 0:
            return tm
    return mpad


def _cout_tile(cout, b, cin, tm):
    """Output-channel tile; bounds the (B, TO, Cin, TM) f32 in-kernel temp."""
    cap = 2 * 1024 * 1024
    per_channel = 4 * b * cin * tm
    if cout <= 8 or cout * per_channel <= cap:
        return cout
    to = max(8, int(cap // per_channel) // 8 * 8)
    while to > 8 and cout % to:
        to -= 8
    return to if (cout % to == 0) else cout


def spectral_contract(x_c, w_c):
    """einsum('bim,oim->bom') over complex inputs, done as split re/im f32.

    x_c : (B, Cin, M) complex64      w_c : (Cout, Cin, M) complex64
    Returns (out_r, out_i), each (B, Cout, M) float32.
    """
    B, Cin, M = x_c.shape
    Cout = w_c.shape[0]

    mpad = ((M + 127) // 128) * 128          # lane-dense, unmasked stores
    pad = mpad - M

    xr = jnp.pad(jnp.real(x_c).astype(jnp.float32), ((0, 0), (0, 0), (0, pad)))
    xi = jnp.pad(jnp.imag(x_c).astype(jnp.float32), ((0, 0), (0, 0), (0, pad)))
    wr = jnp.pad(jnp.real(w_c).astype(jnp.float32), ((0, 0), (0, 0), (0, pad)))
    wi = jnp.pad(jnp.imag(w_c).astype(jnp.float32), ((0, 0), (0, 0), (0, pad)))

    tm = _mode_tile(mpad)
    to = _cout_tile(Cout, B, Cin, tm)

    # Mode axis outermost (large, parallel, no x duplication across cores);
    # x's index_map is constant along the inner Cout axis -> no re-DMA of x.
    x_spec = pl.BlockSpec((B, Cin, tm), lambda mi, co: (0, 0, mi))
    w_spec = pl.BlockSpec((to, Cin, tm), lambda mi, co: (co, 0, mi))
    o_spec = pl.BlockSpec((B, to, tm), lambda mi, co: (0, co, mi))

    blk_bytes = 4 * tm * (2 * B * Cin + 2 * to * Cin + 2 * B * to)
    vmem_limit = int(min(64 << 20, max(32 << 20, 4 * blk_bytes)))

    out_r, out_i = pl.pallas_call(
        _spectral_contract_kernel,
        grid=(mpad // tm, Cout // to),
        in_specs=[x_spec, x_spec, w_spec, w_spec],
        out_specs=[o_spec, o_spec],
        out_shape=[
            jax.ShapeDtypeStruct((B, Cout, mpad), jnp.float32),
            jax.ShapeDtypeStruct((B, Cout, mpad), jnp.float32),
        ],
        compiler_params=pltpu.CompilerParams(
            dimension_semantics=("parallel", "parallel"),
            vmem_limit_bytes=vmem_limit,
        ),
    )(xr, xi, wr, wi)

    return out_r[:, :, :M], out_i[:, :, :M]


def _forward_impl(x, weight, bias, modes1, modes2, indices=0, fft_norm="backward"):
    """Forward pass of FactorizedSpectralConv2d (super_res = 1).

    x      : (B, Cin, H, W) float
    weight : (2 * n_layers, Cin, Cout, modes1, modes2) complex64
             (dense form of the factorized weight, i.e. what _get_weight() gives)
    bias   : (Cout, 1, 1) float
    """
    B, Cin, H, W = x.shape
    Cout = weight.shape[2]
    Wf = W // 2 + 1
    in_dtype = x.dtype

    if 2 * modes1 > H or modes2 > Wf:
        raise ValueError(
            f"modes ({modes1}, {modes2}) too large for spatial size ({H}, {W}): "
            f"need 2*modes1 <= H and modes2 <= W//2+1")

    xf = jnp.fft.rfft2(x.astype(jnp.float32), norm=fft_norm)  # (B, Cin, H, Wf) c64

    # Stack both low-frequency corners along the mode-row axis and flatten the
    # mode dims into one lane-dense axis M = 2*modes1*modes2.
    x_modes = jnp.concatenate(
        [xf[:, :, :modes1, :modes2], xf[:, :, H - modes1:, :modes2]], axis=2)
    x_modes = x_modes.reshape(B, Cin, 2 * modes1 * modes2)

    w_both = weight[2 * indices:2 * indices + 2]              # (2, Cin, Cout, m1, m2)
    w_modes = jnp.transpose(w_both, (2, 1, 0, 3, 4)).reshape(
        Cout, Cin, 2 * modes1 * modes2)                       # (Cout, Cin, M)

    out_r, out_i = spectral_contract(x_modes, w_modes)        # (B, Cout, M) f32

    # Single complex recombine on the small mode slab; place the two corners
    # with concatenate + pad instead of zeros + double scatter.
    out_c = lax.complex(out_r, out_i).reshape(B, Cout, 2 * modes1, modes2)
    top = out_c[:, :, :modes1, :]
    bot = out_c[:, :, modes1:, :]
    mid = jnp.zeros((B, Cout, H - 2 * modes1, modes2), jnp.complex64)
    out_fft = jnp.concatenate([top, mid, bot], axis=2)        # (B, Cout, H, m2)
    out_fft = jnp.pad(out_fft, ((0, 0), (0, 0), (0, 0), (0, Wf - modes2)))

    # TODO(synk): super_res != 1 (strided mode placement + enlarged irfft2 output) not implemented.
    y = jnp.fft.irfft2(out_fft, s=(H, W), norm=fft_norm).astype(in_dtype)
    return y + bias                                           # bias (Cout, 1, 1)


factorized_spectral_conv2d_forward = jax.jit(
    _forward_impl, static_argnames=("modes1", "modes2", "indices", "fft_norm"))


if __name__ == "__main__":
    key = jax.random.PRNGKey(0)

    def run_case(case_key, B, Cin, Cout, H, W, m1, m2):
        scale = 1.0 / (Cin * Cout)
        k1, k2, k3, k4 = jax.random.split(case_key, 4)
        # Deterministic synthetic parameters (dense equivalent of the factorized weight).
        w_real = jax.random.normal(k1, (2, Cin, Cout, m1, m2), jnp.float32)
        w_imag = jax.random.normal(k2, (2, Cin, Cout, m1, m2), jnp.float32)
        weight = (scale * (w_real + 1j * w_imag)).astype(jnp.complex64)
        bias = scale * jax.random.normal(k3, (Cout, 1, 1), jnp.float32)
        x = jax.random.normal(k4, (B, Cin, H, W), jnp.float32)

        y = factorized_spectral_conv2d_forward(x, weight, bias,
                                               modes1=m1, modes2=m2)
        y = jax.block_until_ready(y)

        # Pure-JAX reference of the same forward.
        xf = jnp.fft.rfft2(x, norm="backward")
        ref_fft = jnp.zeros((B, Cout, H, W // 2 + 1), jnp.complex64)
        ref_fft = ref_fft.at[:, :, :m1, :m2].set(
            jnp.einsum("bixy,ioxy->boxy", xf[:, :, :m1, :m2], weight[0]))
        ref_fft = ref_fft.at[:, :, H - m1:, :m2].set(
            jnp.einsum("bixy,ioxy->boxy", xf[:, :, H - m1:, :m2], weight[1]))
        y_ref = jnp.fft.irfft2(ref_fft, s=(H, W), norm="backward") + bias

        assert y.shape == (B, Cout, H, W), y.shape
        assert jnp.allclose(y, y_ref, atol=1e-4, rtol=1e-4), "mismatch vs reference"

    k_a, k_b = jax.random.split(key)
    # Primary small case (matches the module defaults used previously).
    run_case(k_a, B=2, Cin=4, Cout=4, H=16, W=16, m1=4, m2=4)
    # Rectangular case exercising Cin != Cout and lane padding (M=70 -> 128).
    run_case(k_b, B=2, Cin=6, Cout=8, H=20, W=24, m1=5, m2=7)

    print("KERNEL_OK")
</pallas_src>

<mosaic_0001>
module attributes {stable_mosaic.version = 11 : i64} {
  func.func @_spectral_contract_kernel(%arg0: i32, %arg1: i32, %arg2: memref<2x4x128xf32, #tpu.memory_space<vmem>>, %arg3: memref<2x4x128xf32, #tpu.memory_space<vmem>>, %arg4: memref<4x4x128xf32, #tpu.memory_space<vmem>>, %arg5: memref<4x4x128xf32, #tpu.memory_space<vmem>>, %arg6: memref<2x4x128xf32, #tpu.memory_space<vmem>>, %arg7: memref<2x4x128xf32, #tpu.memory_space<vmem>>) attributes {dimension_semantics = [#tpu.dimension_semantics<parallel>, #tpu.dimension_semantics<parallel>], iteration_bounds = array<i64: 1, 1>, scalar_prefetch = 0 : i64, scratch_operands = 0 : i64, tpu.core_type = #tpu.core_type<tc>, window_params = [{transform_indices = @transform_0, window_bounds = array<i64: 2, 4, 128>}, {transform_indices = @transform_1, window_bounds = array<i64: 2, 4, 128>}, {transform_indices = @transform_2, window_bounds = array<i64: 4, 4, 128>}, {transform_indices = @transform_3, window_bounds = array<i64: 4, 4, 128>}, {transform_indices = @transform_4, window_bounds = array<i64: 2, 4, 128>}, {transform_indices = @transform_5, window_bounds = array<i64: 2, 4, 128>}]} {
    %c0 = arith.constant 0 : index
    %c0_0 = arith.constant 0 : index
    %c0_1 = arith.constant 0 : index
    %0 = vector.load %arg2[%c0, %c0_0, %c0_1] : memref<2x4x128xf32, #tpu.memory_space<vmem>>, vector<2x4x128xf32>
    %1 = vector.shape_cast %0 : vector<2x4x128xf32> to vector<2x1x4x128xf32>
    %c0_2 = arith.constant 0 : index
    %c0_3 = arith.constant 0 : index
    %c0_4 = arith.constant 0 : index
    %2 = vector.load %arg3[%c0_2, %c0_3, %c0_4] : memref<2x4x128xf32, #tpu.memory_space<vmem>>, vector<2x4x128xf32>
    %3 = vector.shape_cast %2 : vector<2x4x128xf32> to vector<2x1x4x128xf32>
    %c0_5 = arith.constant 0 : index
    %c0_6 = arith.constant 0 : index
    %c0_7 = arith.constant 0 : index
    %4 = vector.load %arg4[%c0_5, %c0_6, %c0_7] : memref<4x4x128xf32, #tpu.memory_space<vmem>>, vector<4x4x128xf32>
    %5 = vector.shape_cast %4 : vector<4x4x128xf32> to vector<1x4x4x128xf32>
    %c0_8 = arith.constant 0 : index
    %c0_9 = arith.constant 0 : index
    %c0_10 = arith.constant 0 : index
    %6 = vector.load %arg5[%c0_8, %c0_9, %c0_10] : memref<4x4x128xf32, #tpu.memory_space<vmem>>, vector<4x4x128xf32>
    %7 = vector.shape_cast %6 : vector<4x4x128xf32> to vector<1x4x4x128xf32>
    %8 = vector.broadcast %1 : vector<2x1x4x128xf32> to vector<2x4x4x128xf32>
    %9 = vector.broadcast %5 : vector<1x4x4x128xf32> to vector<2x4x4x128xf32>
    %10 = arith.mulf %8, %9 : vector<2x4x4x128xf32>
    %11 = vector.broadcast %3 : vector<2x1x4x128xf32> to vector<2x4x4x128xf32>
    %12 = vector.broadcast %7 : vector<1x4x4x128xf32> to vector<2x4x4x128xf32>
    %13 = arith.mulf %11, %12 : vector<2x4x4x128xf32>
    %14 = arith.subf %10, %13 : vector<2x4x4x128xf32>
    %cst = arith.constant dense<0.000000e+00> : vector<2x4x128xf32>
    %15 = vector.multi_reduction <add>, %14, %cst [2] : vector<2x4x4x128xf32> to vector<2x4x128xf32>
    %c0_11 = arith.constant 0 : index
    %c0_12 = arith.constant 0 : index
    %c0_13 = arith.constant 0 : index
    %16 = vector.load %arg6[%c0_11, %c0_12, %c0_13] : memref<2x4x128xf32, #tpu.memory_space<vmem>>, vector<2x4x128xf32>
    tpu.vector_store %arg6[%c0_11, %c0_12, %c0_13], %15 {strides = array<i32>} : memref<2x4x128xf32, #tpu.memory_space<vmem>>, vector<2x4x128xf32>,
    %17 = vector.broadcast %1 : vector<2x1x4x128xf32> to vector<2x4x4x128xf32>
    %18 = vector.broadcast %7 : vector<1x4x4x128xf32> to vector<2x4x4x128xf32>
    %19 = arith.mulf %17, %18 : vector<2x4x4x128xf32>
    %20 = vector.broadcast %3 : vector<2x1x4x128xf32> to vector<2x4x4x128xf32>
    %21 = vector.broadcast %5 : vector<1x4x4x128xf32> to vector<2x4x4x128xf32>
    %22 = arith.mulf %20, %21 : vector<2x4x4x128xf32>
    %23 = arith.addf %19, %22 : vector<2x4x4x128xf32>
    %cst_14 = arith.constant dense<0.000000e+00> : vector<2x4x128xf32>
    %24 = vector.multi_reduction <add>, %23, %cst_14 [2] : vector<2x4x4x128xf32> to vector<2x4x128xf32>
    %c0_15 = arith.constant 0 : index
    %c0_16 = arith.constant 0 : index
    %c0_17 = arith.constant 0 : index
    %25 = vector.load %arg7[%c0_15, %c0_16, %c0_17] : memref<2x4x128xf32, #tpu.memory_space<vmem>>, vector<2x4x128xf32>
    tpu.vector_store %arg7[%c0_15, %c0_16, %c0_17], %24 {strides = array<i32>} : memref<2x4x128xf32, #tpu.memory_space<vmem>>, vector<2x4x128xf32>,
    return
  }
  func.func @transform_0(%arg0: i32, %arg1: i32) -> (i32, i32, i32) {
    %c0_i32 = arith.constant 0 : i32
    %c0_i32_0 = arith.constant 0 : i32
    %c0_i32_1 = arith.constant 0 : i32
    return %c0_i32, %c0_i32_0, %arg0 : i32, i32, i32
  }
  func.func @transform_1(%arg0: i32, %arg1: i32) -> (i32, i32, i32) {
    %c0_i32 = arith.constant 0 : i32
    %c0_i32_0 = arith.constant 0 : i32
    %c0_i32_1 = arith.constant 0 : i32
    return %c0_i32, %c0_i32_0, %arg0 : i32, i32, i32
  }
  func.func @transform_2(%arg0: i32, %arg1: i32) -> (i32, i32, i32) {
    %c0_i32 = arith.constant 0 : i32
    %c0_i32_0 = arith.constant 0 : i32
    return %arg1, %c0_i32, %arg0 : i32, i32, i32
  }
  func.func @transform_3(%arg0: i32, %arg1: i32) -> (i32, i32, i32) {
    %c0_i32 = arith.constant 0 : i32
    %c0_i32_0 = arith.constant 0 : i32
    return %arg1, %c0_i32, %arg0 : i32, i32, i32
  }
  func.func @transform_4(%arg0: i32, %arg1: i32) -> (i32, i32, i32) {
    %c0_i32 = arith.constant 0 : i32
    %c0_i32_0 = arith.constant 0 : i32
    return %c0_i32, %arg1, %arg0 : i32, i32, i32
  }
  func.func @transform_5(%arg0: i32, %arg1: i32) -> (i32, i32, i32) {
    %c0_i32 = arith.constant 0 : i32
    %c0_i32_0 = arith.constant 0 : i32
    return %c0_i32, %arg1, %arg0 : i32, i32, i32
  }
}

</mosaic_0001>

<bundles_post_ra>
// kernel: custom-call
= control target key start
LH: loop header
LB: loop body
LE: loop exit
PB: predicated region body
PF: predicated region fallthrough
CT: control target
= control target key end

     0   :  { %2 = vsyncpa [#allocation0], 0  ;;  %s47_s0 = inlined_call_operand.hbm [shape: c64[2,4,4,4,4], index: 0, kind: input, shape index: {}]   ;;  %s48_s1 = inlined_call_operand.vmem [shape: f32[2,4,4,4,4], index: 1, kind: output, shape index: {}]  }
   0x1   :  { %s3_s8 = sshll.u32 %s48_s1, 4  ;;  %s4_s8 = int_to_ptr.vmem [resolvable:$true] %s3_s8 }
   0x2   :  { %s17_s9 = scalar_lea.vmem %s4_s8, 2048  ;;  %p22_p1 = scmp.lt.s32.totalorder %s4_s8, %s4_s8 }
   0x3   :  { %p18_p0 = scmp.ne.s32.totalorder %s4_s8, %s17_s9  ;;  %p23_p2 = scmp.lt.s32.totalorder %s17_s9, %s17_s9 }
   0x5   :  { %p24_p3 = por %p23_p2, %p22_p1 }
   0x7   :  { %p25_p4 = pnand %p24_p3, %p18_p0 }
   0x9   :  { %28 = shalt.err (!%p25_p4)  }
   0xa   :  { %6 = dma.hbm_to_vmem [thread:$0]  %s47_s0, 2048, %s4_s8, [#allocation0] }
   0xb   :  { %29 = dma.done.wait [#allocation0], 2048  }
   0xc   :  { %30 = vsyncadd [#allocation0], 4294965248 }
   0xd   :  { %8 = vsyncpa [#allocation0], 1 }

// kernel: custom-call.1
= control target key start
LH: loop header
LB: loop body
LE: loop exit
PB: predicated region body
PF: predicated region fallthrough
CT: control target
= control target key end

     0   :  { %s51_s0 = inlined_call_operand.hbm [shape: c64[2,4,4,4,4], index: 0, kind: input, shape index: {}]   ;;  %s52_s1 = inlined_call_operand.vmem [shape: f32[2,4,4,4,4], index: 1, kind: output, shape index: {}]  }
   0x1   :  { %s2_s8 = scalar_lea.hbm %s51_s0, 2048 }
   0x2   :  { %3 = vsyncpa [#allocation0], 0  ;;  %s4_s11 = sshll.u32 %s52_s1, 4  ;;  %s5_s11 = int_to_ptr.vmem [resolvable:$true] %s4_s11 }
   0x3   :  { %s20_s12 = scalar_lea.vmem %s5_s11, 2048  ;;  %p25_p1 = scmp.lt.s32.totalorder %s5_s11, %s5_s11 }
   0x4   :  { %p21_p0 = scmp.ne.s32.totalorder %s5_s11, %s20_s12  ;;  %p26_p2 = scmp.lt.s32.totalorder %s20_s12, %s20_s12 }
   0x6   :  { %p27_p3 = por %p26_p2, %p25_p1 }
   0x8   :  { %p28_p4 = pnand %p27_p3, %p21_p0 }
   0xa   :  { %31 = shalt.err (!%p28_p4)  }
   0xb   :  { %7 = dma.hbm_to_vmem [thread:$0]  %s2_s8, 2048, %s5_s11, [#allocation0] }
   0xc   :  { %33 = dma.done.wait [#allocation0], 2048  }
   0xd   :  { %34 = vsyncadd [#allocation0], 4294965248 }
   0xe   :  { %9 = vsyncpa [#allocation0], 1 }

// kernel: reverse.0
= control target key start
LH: loop header
LB: loop body
LE: loop exit
PB: predicated region body
PF: predicated region fallthrough
CT: control target
= control target key end

     0   :  { %v72_v3 = vlaneseq  ;;  %v65_v9 = vld [vmem:[#allocation0 + $0x7] ss:$-1 sm:$0xff]  ;;  %v79_v12 = vld [vmem:[#allocation0 + $0x17] ss:$-1 sm:$0xff]  ;;  %s331_s0 = inlined_call_operand.vmem [shape: f32[2,4,16,7], index: 0, kind: input, shape index: {}]   ;;  %s332_s1 = inlined_call_operand.vmem [shape: f32[2,4,16,7], index: 1, kind: output, shape index: {}]  }
   0x1   :  { %v45_v0 = vld [vmem:[%s331_s0] sm:$0xff]  ;;  %v47_v1 = vld [vmem:[%s331_s0 + $0x8] sm:$0xff]  ;;  %v49_v2 = vld [vmem:[%s331_s0 + $0x10] sm:$0xff]  ;;  %v66_v10 = vrot.slane %v65_v9, 1  ;;  %v80_v14 = vrot.slane %v79_v12, 1 }
   0x2   :  { %46 = vst [vmem:[#allocation0 + $0x8] sm:$0xff] %v45_v0  ;;  %48 = vst [vmem:[#allocation0 + $0x18] sm:$0xff] %v47_v1  ;;  %v51_v4 = vld [vmem:[%s331_s0 + $0x18] sm:$0xff]  ;;  %v53_v5 = vld [vmem:[%s331_s0 + $0x20] sm:$0xff]  ;;  %v73_v11 = vshrl.u32 %v72_v3, 7 }
   0x3   :  { %50 = vst [vmem:[#allocation0 + $0x28] sm:$0xff] %v49_v2  ;;  %v55_v6 = vld [vmem:[%s331_s0 + $0x28] sm:$0xff]  ;;  %52 = vst [vmem:[#allocation0 + $0x38] sm:$0xff] %v51_v4  ;;  %v57_v7 = vld [vmem:[%s331_s0 + $0x30] sm:$0xff] }
   0x4   :  { %54 = vst [vmem:[#allocation0 + $0x48] sm:$0xff] %v53_v5  ;;  %56 = vst [vmem:[#allocation0 + $0x58] sm:$0xff] %v55_v6  ;;  %v59_v8 = vld [vmem:[%s331_s0 + $0x38] sm:$0xff]  ;;  %v93_v13 = vld [vmem:[#allocation0 + $0x27] ss:$-1 sm:$0xff]  ;;  %vm74_vm0 = vcmp.lt.s32.totalorder %v73_v11, 7 }
   0x5   :  { %58 = vst [vmem:[#allocation0 + $0x68] sm:$0xff] %v57_v7  ;;  %60 = vst [vmem:[#allocation0 + $0x78] sm:$0xff] %v59_v8  ;;  %v94_v15 = vrot.slane %v93_v13, 1  ;;  %v107_v16 = vld [vmem:[#allocation0 + $0x37] ss:$-1 sm:$0xff] }
   0x6   :  { %67 = vst [vmem:[#allocation1] sm:$0xff] %v66_v10  ;;  %v108_v17 = vrot.slane %v107_v16, 1  ;;  %v121_v18 = vld [vmem:[#allocation0 + $0x47] ss:$-1 sm:$0xff]  ;;  %v135_v19 = vld [vmem:[#allocation0 + $0x57] ss:$-1 sm:$0xff] }
   0x7   :  { %81 = vst [vmem:[#allocation1 + $0x8] sm:$0xff] %v80_v14  ;;  %95 = vst [vmem:[#allocation1 + $0x10] sm:$0xff] %v94_v15  ;;  %v122_v20 = vrot.slane %v121_v18, 1  ;;  %v136_v21 = vrot.slane %v135_v19, 1  ;;  %v149_v22 = vld [vmem:[#allocation0 + $0x67] ss:$-1 sm:$0xff] }
   0x8   :  { %v163_v23 = vld [vmem:[#allocation0 + $0x77] ss:$-1 sm:$0xff]  ;;  %109 = vst [vmem:[#allocation1 + $0x18] sm:$0xff] %v108_v17  ;;  %v150_v24 = vrot.slane %v149_v22, 1 }
   0x9   :  { %v164_v25 = vrot.slane %v163_v23, 1  ;;  %v70_v26 = vld [vmem:[#allocation0 + $0xf] ss:$-1 sm:$0xff]  ;;  %v84_v27 = vld [vmem:[#allocation0 + $0x1f] ss:$-1 sm:$0xff]  ;;  %123 = vst [vmem:[#allocation1 + $0x20] sm:$0xff] %v122_v20 }
   0xa   :  { %v98_v28 = vld [vmem:[#allocation0 + $0x2f] ss:$-1 sm:$0xff]  ;;  %137 = vst [vmem:[#allocation1 + $0x28] sm:$0xff] %v136_v21  ;;  %v71_v29 = vrot.slane %v70_v26, 1  ;;  %v85_v30 = vrot.slane %v84_v27, 1  ;;  %151 = vst [vmem:[#allocation1 + $0x30] sm:$0xff] %v150_v24 }
   0xb   :  { %v99_v31 = vrot.slane %v98_v28, 1  ;;  %v112_v32 = vld [vmem:[#allocation0 + $0x3f] ss:$-1 sm:$0xff]  ;;  %165 = vst [vmem:[#allocation1 + $0x38] sm:$0xff] %v164_v25  ;;  %v126_v34 = vld [vmem:[#allocation0 + $0x4f] ss:$-1 sm:$0xff] }
   0xc   :  { %v113_v33 = vrot.slane %v112_v32, 1  ;;  %v140_v35 = vld [vmem:[#allocation0 + $0x5f] ss:$-1 sm:$0xff]  ;;  %75 = vst.msk [vmem:[#allocation1] sm:$0xff] %vm74_vm0, %v71_v29  ;;  %89 = vst.msk [vmem:[#allocation1 + $0x8] sm:$0xff] %vm74_vm0, %v85_v30  ;;  %v127_v36 = vrot.slane %v126_v34, 1 }
   0xd   :  { %103 = vst.msk [vmem:[#allocation1 + $0x10] sm:$0xff] %vm74_vm0, %v99_v31  ;;  %v141_v37 = vrot.slane %v140_v35, 1  ;;  %v154_v38 = vld [vmem:[#allocation0 + $0x6f] ss:$-1 sm:$0xff]  ;;  %v168_v39 = vld [vmem:[#allocation0 + $0x7f] ss:$-1 sm:$0xff] }
   0xe   :  { %117 = vst.msk [vmem:[#allocation1 + $0x18] sm:$0xff] %vm74_vm0, %v113_v33  ;;  %v155_v40 = vrot.slane %v154_v38, 1  ;;  %v169_v41 = vrot.slane %v168_v39, 1  ;;  %131 = vst.msk [vmem:[#allocation1 + $0x20] sm:$0xff] %vm74_vm0, %v127_v36 }
   0xf   :  { %145 = vst.msk [vmem:[#allocation1 + $0x28] sm:$0xff] %vm74_vm0, %v141_v37 }
  0x10   :  { %159 = vst.msk [vmem:[#allocation1 + $0x30] sm:$0xff] %vm74_vm0, %v155_v40  ;;  %173 = vst.msk [vmem:[#allocation1 + $0x38] sm:$0xff] %vm74_vm0, %v169_v41 }
  0x13   :  { %v216_v42 = vld [vmem:[#allocation1] sm:$0xff]  ;;  %v218_v43 = vld [vmem:[#allocation1 + $0x8] sm:$0xff] }
  0x14   :  { %v220_v44 = vld [vmem:[#allocation1 + $0x10] sm:$0xff]  ;;  %217 = vst [vmem:[%s332_s1] sm:$0xff] %v216_v42  ;;  %219 = vst [vmem:[%s332_s1 + $0x8] sm:$0xff] %v218_v43 }
  0x15   :  { %221 = vst [vmem:[%s332_s1 + $0x10] sm:$0xff] %v220_v44  ;;  %v222_v45 = vld [vmem:[#allocation1 + $0x18] sm:$0xff]  ;;  %v224_v46 = vld [vmem:[#allocation1 + $0x20] sm:$0xff] }
  0x16   :  { %223 = vst [vmem:[%s332_s1 + $0x18] sm:$0xff] %v222_v45  ;;  %v226_v47 = vld [vmem:[#allocation1 + $0x28] sm:$0xff]  ;;  %225 = vst [vmem:[%s332_s1 + $0x20] sm:$0xff] %v224_v46 }
  0x17   :  { %227 = vst [vmem:[%s332_s1 + $0x28] sm:$0xff] %v226_v47  ;;  %v228_v48 = vld [vmem:[#allocation1 + $0x30] sm:$0xff]  ;;  %v230_v49 = vld [vmem:[#allocation1 + $0x38] sm:$0xff] }
  0x18   :  { %229 = vst [vmem:[%s332_s1 + $0x30] sm:$0xff] %v228_v48  ;;  %231 = vst [vmem:[%s332_s1 + $0x38] sm:$0xff] %v230_v49 }

// kernel: _forward_impl.1
= control target key start
LH: loop header
LB: loop body
LE: loop exit
PB: predicated region body
PF: predicated region fallthrough
CT: control target
= control target key end

     0   :  { %vm55_vm0 = vcmask 1043456   ;;  %vm120_vm1 = vcmask 1041409   ;;  %vm122_vm2 = vcmask 1042434   ;;  %vm124_vm3 = vcmask 1043459   ;;  %s442_s0 = inlined_call_operand.vmem [shape: f32[2,4,128], index: 0, kind: input, shape index: {}]   ;;  %s443_s1 = inlined_call_operand.vmem [shape: f32[2,4,128], index: 1, kind: input, shape index: {}]   ;;  %s444_s2 = inlined_call_operand.vmem [shape: f32[4,4,128], index: 2, kind: input, shape index: {}]   ;;  %s445_s3 = inlined_call_operand.vmem [shape: f32[4,4,128], index: 3, kind: input, shape index: {}]   ;;  %s446_s4 = inlined_call_operand.vmem [shape: f32[2,4,128], index: 4, kind: output, shape index: {0}]   ;;  %s447_s5 = inlined_call_operand.vmem [shape: f32[2,4,128], index: 5, kind: output, shape index: {1}]  }
   0x1   :  { %v272_v0 = vld [vmem:[%s442_s0] sm:$0xf]  ;;  %v287_v3 = vld [vmem:[%s444_s2 + $0x4] sm:$0xf]  ;;  %v292_v4 = vld [vmem:[%s444_s2 + $0x8] sm:$0xf] }
   0x2   :  { %v277_v1 = vld [vmem:[%s443_s1] sm:$0xf]  ;;  %v297_v5 = vld [vmem:[%s444_s2 + $0xc] sm:$0xf]  ;;  %v313_v9 = vld [vmem:[%s445_s3 + $0x4] sm:$0xf]  ;;  %v32_v11 = vmul.f32 %v287_v3, %v272_v0  ;;  %v33_v12 = vmul.f32 %v292_v4, %v272_v0 }
   0x3   :  { %v282_v2 = vld [vmem:[%s444_s2] sm:$0xf]  ;;  %v318_v10 = vld [vmem:[%s445_s3 + $0x8] sm:$0xf]  ;;  %v34_v13 = vmul.f32 %v297_v5, %v272_v0  ;;  %v328_v14 = vmul.f32 %v287_v3, %v277_v1  ;;  %v333_v15 = vld [vmem:[%s445_s3 + $0xc] sm:$0xf]  ;;  %v40_v17 = vmul.f32 %v313_v9, %v277_v1 }
   0x4   :  { %v31_v6 = vmul.f32 %v282_v2, %v272_v0  ;;  %v303_v7 = vmul.f32 %v282_v2, %v277_v1  ;;  %v308_v8 = vld [vmem:[%s445_s3] sm:$0xf]  ;;  %v41_v18 = vmul.f32 %v318_v10, %v277_v1  ;;  %v344_v19 = vld [vmem:[%s442_s0 + $0x4] sm:$0xf]  ;;  %v42_v22 = vmul.f32 %v333_v15, %v277_v1 }
   0x5   :  { %v39_v16 = vmul.f32 %v308_v8, %v277_v1  ;;  %v349_v20 = vld [vmem:[%s443_s1 + $0x4] sm:$0xf]  ;;  %v353_v21 = vmul.f32 %v308_v8, %v272_v0  ;;  %v35_v23 = vmul.f32 %v282_v2, %v344_v19  ;;  %v36_v24 = vmul.f32 %v287_v3, %v344_v19 }
   0x6   :  { %v37_v25 = vmul.f32 %v292_v4, %v344_v19  ;;  %v48_v27 = vsub.f32 %v32_v11, %v40_v17  ;;  %v49_v28 = vsub.f32 %v33_v12, %v41_v18  ;;  %v38_v29 = vmul.f32 %v297_v5, %v344_v19 }
   0x7   :  { %v47_v26 = vsub.f32 %v31_v6, %v39_v16  ;;  %v50_v30 = vsub.f32 %v34_v13, %v42_v22  ;;  %v43_v31 = vmul.f32 %v308_v8, %v349_v20  ;;  %v44_v32 = vmul.f32 %v313_v9, %v349_v20 }
   0x8   :  { %v45_v33 = vmul.f32 %v318_v10, %v349_v20  ;;  %v63_v35 = vsel %vm55_vm0, %v48_v27, 0.0  ;;  %v70_v36 = vsel %vm55_vm0, %v49_v28, 0.0  ;;  %v46_v37 = vmul.f32 %v333_v15, %v349_v20 }
   0x9   :  { %v56_v34 = vsel %vm55_vm0, %v47_v26, 0.0  ;;  %v64_v39 = vrot.slane %v63_v35, 4  ;;  %v71_v40 = vrot.slane %v70_v36, 4  ;;  %v77_v41 = vsel %vm55_vm0, %v50_v30, 0.0 }
   0xa   :  { %v57_v38 = vrot.slane %v56_v34, 4  ;;  %v78_v42 = vrot.slane %v77_v41, 4  ;;  %v51_v43 = vsub.f32 %v35_v23, %v43_v31  ;;  %v52_v44 = vsub.f32 %v36_v24, %v44_v32 }
   0xb   :  { %v53_v45 = vsub.f32 %v37_v25, %v45_v33  ;;  %v65_v47 = vadd.f32 %v64_v39, %v63_v35  ;;  %v72_v48 = vadd.f32 %v71_v40, %v70_v36  ;;  %v54_v49 = vsub.f32 %v38_v29, %v46_v37 }
   0xc   :  { %v58_v46 = vadd.f32 %v57_v38, %v56_v34  ;;  %v79_v50 = vadd.f32 %v78_v42, %v77_v41  ;;  %v84_v51 = vsel %vm55_vm0, %v51_v43, 0.0  ;;  %v91_v52 = vsel %vm55_vm0, %v52_v44, 0.0 }
   0xd   :  { %v98_v53 = vsel %vm55_vm0, %v53_v45, 0.0  ;;  %v66_v55 = vrot.slane %v65_v47, 2  ;;  %v73_v56 = vrot.slane %v72_v48, 2  ;;  %v85_v57 = vrot.slane %v84_v51, 4 }
   0xe   :  { %v59_v54 = vrot.slane %v58_v46, 2  ;;  %v80_v58 = vrot.slane %v79_v50, 2  ;;  %v92_v59 = vrot.slane %v91_v52, 4  ;;  %v99_v60 = vrot.slane %v98_v53, 4 }
   0xf   :  { %v105_v61 = vsel %vm55_vm0, %v54_v49, 0.0  ;;  %v67_v63 = vadd.f32 %v66_v55, %v65_v47  ;;  %v74_v6 = vadd.f32 %v73_v56, %v72_v48  ;;  %v86_v11 = vadd.f32 %v85_v57, %v84_v51 }
  0x10   :  { %v60_v62 = vadd.f32 %v59_v54, %v58_v46  ;;  %v81_v12 = vadd.f32 %v80_v58, %v79_v50  ;;  %v93_v13 = vadd.f32 %v92_v59, %v91_v52  ;;  %v100_v16 = vadd.f32 %v99_v60, %v98_v53 }
  0x11   :  { %v106_v17 = vrot.slane %v105_v61, 4  ;;  %v68_v22 = vrot.slane %v67_v63, 1  ;;  %v75_v23 = vrot.slane %v74_v6, 1  ;;  %v87_v24 = vrot.slane %v86_v11, 2 }
  0x12   :  { %v61_v18 = vrot.slane %v60_v62, 1  ;;  %v82_v25 = vrot.slane %v81_v12, 1  ;;  %v94_v26 = vrot.slane %v93_v13, 2  ;;  %v101_v27 = vrot.slane %v100_v16, 2 }
  0x13   :  { %v107_v28 = vadd.f32 %v106_v17, %v105_v61  ;;  %v69_v30 = vadd.f32 %v68_v22, %v67_v63  ;;  %v76_v31 = vadd.f32 %v75_v23, %v74_v6  ;;  %v88_v32 = vadd.f32 %v87_v24, %v86_v11 }
  0x14   :  { %v62_v29 = vadd.f32 %v61_v18, %v60_v62  ;;  %v83_v33 = vadd.f32 %v82_v25, %v81_v12  ;;  %v95_v34 = vadd.f32 %v94_v26, %v93_v13  ;;  %v102_v35 = vadd.f32 %v101_v27, %v100_v16 }
  0x15   :  { %v108_v36 = vrot.slane %v107_v28, 2  ;;  %v89_v38 = vrot.slane %v88_v32, 1  ;;  %v134_v39 = vmul.f32 %v313_v9, %v272_v0  ;;  %v135_v40 = vmul.f32 %v318_v10, %v272_v0 }
  0x16   :  { %v121_v37 = vsel %vm120_vm1, %v69_v30, %v62_v29  ;;  %v96_v42 = vrot.slane %v95_v34, 1  ;;  %v103_v43 = vrot.slane %v102_v35, 1  ;;  %v136_v47 = vmul.f32 %v333_v15, %v272_v0 }
  0x17   :  { %v123_v41 = vsel %vm122_vm2, %v76_v31, %v121_v37  ;;  %v109_v44 = vadd.f32 %v108_v36, %v107_v28  ;;  %v90_v46 = vadd.f32 %v89_v38, %v88_v32  ;;  %v143_v48 = vmul.f32 %v292_v4, %v277_v1 }
  0x18   :  { %v125_v45 = vsel %vm124_vm3, %v83_v33, %v123_v41  ;;  %v97_v49 = vadd.f32 %v96_v42, %v95_v34  ;;  %v104_v50 = vadd.f32 %v103_v43, %v102_v35  ;;  %v144_v52 = vmul.f32 %v297_v5, %v277_v1 }
  0x19   :  { %131 = vst [vmem:[%s446_s4] sm:$0xf] %v125_v45  ;;  %v110_v51 = vrot.slane %v109_v44, 1  ;;  %v149_v53 = vadd.f32 %v303_v7, %v353_v21  ;;  %v150_v54 = vadd.f32 %v328_v14, %v134_v39  ;;  %v151_v55 = vadd.f32 %v143_v48, %v135_v40 }
  0x1a   :  { %v137_v0 = vmul.f32 %v308_v8, %v344_v19  ;;  %v126_v57 = vsel %vm120_vm1, %v97_v49, %v90_v46  ;;  %v152_v58 = vadd.f32 %v144_v52, %v136_v47  ;;  %v138_v59 = vmul.f32 %v313_v9, %v344_v19 }
  0x1b   :  { %v111_v56 = vadd.f32 %v110_v51, %v109_v44  ;;  %v127_v60 = vsel %vm122_vm2, %v104_v50, %v126_v57  ;;  %v157_v1 = vsel %vm55_vm0, %v149_v53, 0.0  ;;  %v164_v61 = vsel %vm55_vm0, %v150_v54, 0.0 }
  0x1c   :  { %v171_v7 = vsel %vm55_vm0, %v151_v55, 0.0  ;;  %v158_v21 = vrot.slane %v157_v1, 4  ;;  %v165_v62 = vrot.slane %v164_v61, 4  ;;  %v178_v63 = vsel %vm55_vm0, %v152_v58, 0.0 }
  0x1d   :  { %v128_v14 = vsel %vm124_vm3, %v111_v56, %v127_v60  ;;  %v172_v8 = vrot.slane %v171_v7, 4  ;;  %v139_v9 = vmul.f32 %v318_v10, %v344_v19  ;;  %v140_v6 = vmul.f32 %v333_v15, %v344_v19 }
  0x1e   :  { %132 = vst [vmem:[%s446_s4 + $0x4] sm:$0xf] %v128_v14  ;;  %v145_v11 = vmul.f32 %v282_v2, %v349_v20  ;;  %v159_v12 = vadd.f32 %v158_v21, %v157_v1  ;;  %v166_v13 = vadd.f32 %v165_v62, %v164_v61  ;;  %v179_v17 = vrot.slane %v178_v63, 4 }
  0x1f   :  { %v173_v16 = vadd.f32 %v172_v8, %v171_v7  ;;  %v146_v18 = vmul.f32 %v287_v3, %v349_v20  ;;  %v147_v22 = vmul.f32 %v292_v4, %v349_v20  ;;  %v148_v23 = vmul.f32 %v297_v5, %v349_v20 }
  0x20   :  { %v153_v10 = vadd.f32 %v145_v11, %v137_v0  ;;  %v160_v24 = vrot.slane %v159_v12, 2  ;;  %v167_v25 = vrot.slane %v166_v13, 2  ;;  %v180_v19 = vadd.f32 %v179_v17, %v178_v63 }
  0x21   :  { %v174_v15 = vrot.slane %v173_v16, 2  ;;  %v154_v26 = vadd.f32 %v146_v18, %v138_v59  ;;  %v155_v2 = vadd.f32 %v147_v22, %v139_v9  ;;  %v156_v27 = vadd.f32 %v148_v23, %v140_v6 }
  0x22   :  { %v185_v28 = vsel %vm55_vm0, %v153_v10, 0.0  ;;  %v161_v29 = vadd.f32 %v160_v24, %v159_v12  ;;  %v168_v30 = vadd.f32 %v167_v25, %v166_v13  ;;  %v181_v3 = vrot.slane %v180_v19, 2 }
  0x23   :  { %v175_v31 = vadd.f32 %v174_v15, %v173_v16  ;;  %v186_v32 = vrot.slane %v185_v28, 4  ;;  %v192_v4 = vsel %vm55_vm0, %v154_v26, 0.0  ;;  %v199_v33 = vsel %vm55_vm0, %v155_v2, 0.0 }
  0x24   :  { %v206_v5 = vsel %vm55_vm0, %v156_v27, 0.0  ;;  %v162_v20 = vrot.slane %v161_v29, 1  ;;  %v169_v34 = vrot.slane %v168_v30, 1  ;;  %v182_v36 = vadd.f32 %v181_v3, %v180_v19 }
  0x25   :  { %v176_v35 = vrot.slane %v175_v31, 1  ;;  %v187_v37 = vadd.f32 %v186_v32, %v185_v28  ;;  %v193_v38 = vrot.slane %v192_v4, 4  ;;  %v200_v39 = vrot.slane %v199_v33, 4 }
  0x26   :  { %v207_v40 = vrot.slane %v206_v5, 4  ;;  %v163_v41 = vadd.f32 %v162_v20, %v161_v29  ;;  %v170_v42 = vadd.f32 %v169_v34, %v168_v30  ;;  %v183_v44 = vrot.slane %v182_v36, 1 }
  0x27   :  { %v177_v43 = vadd.f32 %v176_v35, %v175_v31  ;;  %v188_v45 = vrot.slane %v187_v37, 2  ;;  %v194_v46 = vadd.f32 %v193_v38, %v192_v4  ;;  %v201_v47 = vadd.f32 %v200_v39, %v199_v33 }
  0x28   :  { %v208_v48 = vadd.f32 %v207_v40, %v206_v5  ;;  %v184_v49 = vadd.f32 %v183_v44, %v182_v36  ;;  %v221_v50 = vsel %vm120_vm1, %v170_v42, %v163_v41 }
  0x29   :  { %v222_v51 = vsel %vm122_vm2, %v177_v43, %v221_v50  ;;  %v189_v52 = vadd.f32 %v188_v45, %v187_v37  ;;  %v195_v53 = vrot.slane %v194_v46, 2  ;;  %v202_v54 = vrot.slane %v201_v47, 2 }
  0x2a   :  { %v223_v55 = vsel %vm124_vm3, %v184_v49, %v222_v51  ;;  %v209_v0 = vrot.slane %v208_v48, 2 }
  0x2b   :  { %229 = vst [vmem:[%s447_s5] sm:$0xf] %v223_v55  ;;  %v190_v56 = vrot.slane %v189_v52, 1  ;;  %v196_v57 = vadd.f32 %v195_v53, %v194_v46  ;;  %v203_v58 = vadd.f32 %v202_v54, %v201_v47 }
  0x2c   :  { %v210_v59 = vadd.f32 %v209_v0, %v208_v48 }
  0x2d   :  { %v191_v60 = vadd.f32 %v190_v56, %v189_v52  ;;  %v197_v1 = vrot.slane %v196_v57, 1  ;;  %v204_v61 = vrot.slane %v203_v58, 1 }
  0x2e   :  { %v211_v7 = vrot.slane %v210_v59, 1 }
  0x2f   :  { %v198_v14 = vadd.f32 %v197_v1, %v196_v57  ;;  %v205_v21 = vadd.f32 %v204_v61, %v203_v58 }
  0x30   :  { %v212_v62 = vadd.f32 %v211_v7, %v210_v59 }
  0x31   :  { %v224_v8 = vsel %vm120_vm1, %v198_v14, %v191_v60 }
  0x32   :  { %v225_v63 = vsel %vm122_vm2, %v205_v21, %v224_v8 }
  0x33   :  { %v226_v9 = vsel %vm124_vm3, %v212_v62, %v225_v63 }
  0x34   :  { %230 = vst [vmem:[%s447_s5 + $0x4] sm:$0xf] %v226_v9 }

</bundles_post_ra>
